<compile_context>
chip_gen: v7x
topology: tpu7x:2x2x1
jax: 0.10.0
libtpu: 0.0.40
codegen_flags: <defaults>
</compile_context>

<pallas_src>
import functools

import jax
import jax.numpy as jnp
from jax.experimental import pallas as pl
from jax.experimental.pallas import tpu as pltpu


def _contrastive_loss_kernel(x0_ref, x1_ref, y_ref, o_ref, *, margin, batch, block_b):
    step = pl.program_id(0)

    @pl.when(step == 0)
    def _():
        o_ref[...] = jnp.zeros_like(o_ref)

    diff = x0_ref[...].astype(jnp.float32) - x1_ref[...].astype(jnp.float32)
    dist_sq = jnp.sum(diff * diff, axis=1, keepdims=True)        # (tb, 1)
    dist = jnp.sqrt(dist_sq + 1e-20)                             # EUP
    mdist = jnp.maximum(margin - dist, 0.0)                      # clamp(min=0)
    y = y_ref[...].astype(jnp.float32)                           # (tb, 1)
    per_row = y * dist_sq + (1.0 - y) * (mdist * mdist)          # (tb, 1)

    # Mask rows of a ragged last batch block (garbage reads past B are dropped
    # by the select, so NaN/Inf in padded rows cannot propagate).
    row = jax.lax.broadcasted_iota(jnp.int32, per_row.shape, 0) + step * block_b
    per_row = jnp.where(row < batch, per_row, 0.0)

    # Accumulate into the grid-resident (1,1) output block.
    o_ref[...] += jnp.sum(per_row, axis=0, keepdims=True)

    @pl.when(step == pl.num_programs(0) - 1)
    def _():
        o_ref[...] = o_ref[...] * jnp.float32(0.5 / batch)


def contrastive_loss(x0, x1, y, *, margin=1.0, max_block_b=512):
    """Pallas ContrastiveLoss. x0, x1: (B, D); y: (B,) labels. Returns scalar."""
    B, D = x0.shape
    assert x1.shape == (B, D), (x0.shape, x1.shape)
    y2 = jnp.asarray(y).reshape(B, 1).astype(jnp.float32)

    if B <= max_block_b:
        tb = B          # block == full array dim -> always layout-legal, grid=(1,)
    else:
        tb = max_block_b  # multiple of 8; ragged last block is masked in-kernel
    grid = (pl.cdiv(B, tb),)

    out = pl.pallas_call(
        functools.partial(
            _contrastive_loss_kernel,
            margin=float(margin),
            batch=B,
            block_b=tb,
        ),
        out_shape=jax.ShapeDtypeStruct((1, 1), jnp.float32),
        grid_spec=pltpu.PrefetchScalarGridSpec(
            num_scalar_prefetch=0,
            grid=grid,
            in_specs=[
                pl.BlockSpec((tb, D), lambda i: (i, 0)),
                pl.BlockSpec((tb, D), lambda i: (i, 0)),
                pl.BlockSpec((tb, 1), lambda i: (i, 0)),
            ],
            out_specs=pl.BlockSpec((1, 1), lambda i: (0, 0)),
        ),
        compiler_params=pltpu.CompilerParams(
            dimension_semantics=("arbitrary",),  # batch axis is a reduction here
        ),
    )(x0, x1, y2)
    return out[0, 0]


if __name__ == "__main__":
    key = jax.random.PRNGKey(0)
    k0, k1, ky = jax.random.split(key, 3)

    # Small shapes consistent with the module: (B, feature) embedding pairs +
    # binary similarity labels.
    B, D = 8, 32
    x0 = jax.random.normal(k0, (B, D), dtype=jnp.float32)
    x1 = jax.random.normal(k1, (B, D), dtype=jnp.float32)
    y = (jax.random.uniform(ky, (B,)) < 0.5).astype(jnp.float32)

    loss = contrastive_loss(x0, x1, y, margin=1.0)
    jax.block_until_ready(loss)

    # Pure-JAX reference mirroring the PyTorch forward exactly.
    diff = x0 - x1
    dist_sq = jnp.sum(diff * diff, axis=1)
    dist = jnp.sqrt(dist_sq + 1e-20)
    mdist = jnp.maximum(1.0 - dist, 0.0)
    ref = jnp.sum(y * dist_sq + (1.0 - y) * mdist * mdist) / 2.0 / B

    assert loss.shape == ()
    assert loss.dtype == jnp.float32
    assert jnp.allclose(loss, ref, rtol=1e-5, atol=1e-6), (float(loss), float(ref))
    print("KERNEL_OK")
</pallas_src>

<mosaic_0001>
module attributes {stable_mosaic.version = 11 : i64} {
  func.func @_contrastive_loss_kernel(%arg0: i32, %arg1: memref<8x32xf32, #tpu.memory_space<vmem>>, %arg2: memref<8x32xf32, #tpu.memory_space<vmem>>, %arg3: memref<8x1xf32, #tpu.memory_space<vmem>>, %arg4: memref<1x1xf32, #tpu.memory_space<vmem>>) attributes {dimension_semantics = [#tpu.dimension_semantics<arbitrary>], iteration_bounds = array<i64: 1>, scalar_prefetch = 0 : i64, scratch_operands = 0 : i64, tpu.core_type = #tpu.core_type<tc>, window_params = [{transform_indices = @transform_0, window_bounds = array<i64: 8, 32>}, {transform_indices = @transform_1, window_bounds = array<i64: 8, 32>}, {transform_indices = @transform_2, window_bounds = array<i64: 8, 1>}, {pipeline_mode = #tpu.pipeline_mode<synchronous>, transform_indices = @transform_3, window_bounds = array<i64: 1, 1>}]} {
    %c0_i32 = arith.constant 0 : i32
    %0 = arith.cmpi eq, %arg0, %c0_i32 : i32
    %1 = arith.extui %0 : i1 to i32
    %c0_i32_0 = arith.constant 0 : i32
    %2 = arith.cmpi ne, %1, %c0_i32_0 : i32
    scf.if %2 {
      %cst_19 = arith.constant 0.000000e+00 : f32
      %39 = vector.broadcast %cst_19 : f32 to vector<1x1xf32>
      %c0_20 = arith.constant 0 : index
      %c0_21 = arith.constant 0 : index
      %40 = vector.load %arg4[%c0_20, %c0_21] : memref<1x1xf32, #tpu.memory_space<vmem>>, vector<1x1xf32>
      tpu.vector_store %arg4[%c0_20, %c0_21], %39 {strides = array<i32>} : memref<1x1xf32, #tpu.memory_space<vmem>>, vector<1x1xf32>,
    } else {
    }
    %c0 = arith.constant 0 : index
    %c0_1 = arith.constant 0 : index
    %3 = vector.load %arg1[%c0, %c0_1] : memref<8x32xf32, #tpu.memory_space<vmem>>, vector<8x32xf32>
    %c0_2 = arith.constant 0 : index
    %c0_3 = arith.constant 0 : index
    %4 = vector.load %arg2[%c0_2, %c0_3] : memref<8x32xf32, #tpu.memory_space<vmem>>, vector<8x32xf32>
    %5 = arith.subf %3, %4 : vector<8x32xf32>
    %6 = arith.mulf %5, %5 : vector<8x32xf32>
    %cst = arith.constant dense<0.000000e+00> : vector<8xf32>
    %7 = vector.multi_reduction <add>, %6, %cst [1] : vector<8x32xf32> to vector<8xf32>
    %8 = vector.shape_cast %7 : vector<8xf32> to vector<8x1xf32>
    %cst_4 = arith.constant 9.99999968E-21 : f32
    %9 = vector.broadcast %cst_4 : f32 to vector<8x1xf32>
    %10 = arith.addf %8, %9 : vector<8x1xf32>
    %11 = math.sqrt %10 : vector<8x1xf32>
    %cst_5 = arith.constant 1.000000e+00 : f32
    %12 = vector.broadcast %cst_5 : f32 to vector<8x1xf32>
    %13 = arith.subf %12, %11 : vector<8x1xf32>
    %cst_6 = arith.constant 0.000000e+00 : f32
    %14 = vector.broadcast %cst_6 : f32 to vector<8x1xf32>
    %15 = arith.maximumf %13, %14 : vector<8x1xf32>
    %c0_7 = arith.constant 0 : index
    %c0_8 = arith.constant 0 : index
    %16 = vector.load %arg3[%c0_7, %c0_8] : memref<8x1xf32, #tpu.memory_space<vmem>>, vector<8x1xf32>
    %17 = arith.mulf %16, %8 : vector<8x1xf32>
    %cst_9 = arith.constant 1.000000e+00 : f32
    %18 = vector.broadcast %cst_9 : f32 to vector<8x1xf32>
    %19 = arith.subf %18, %16 : vector<8x1xf32>
    %20 = arith.mulf %15, %15 : vector<8x1xf32>
    %21 = arith.mulf %19, %20 : vector<8x1xf32>
    %22 = arith.addf %17, %21 : vector<8x1xf32>
    %23 = tpu.iota {dimensions = array<i32: 0>} : vector<8x1xi32>
    %c8_i32 = arith.constant 8 : i32
    %24 = arith.muli %arg0, %c8_i32 : i32
    %25 = vector.broadcast %24 : i32 to vector<8x1xi32>
    %26 = arith.addi %23, %25 : vector<8x1xi32>
    %c8_i32_10 = arith.constant 8 : i32
    %27 = vector.broadcast %c8_i32_10 : i32 to vector<8x1xi32>
    %28 = arith.cmpi slt, %26, %27 : vector<8x1xi32>
    %cst_11 = arith.constant 0.000000e+00 : f32
    %29 = vector.broadcast %cst_11 : f32 to vector<8x1xf32>
    %30 = arith.select %28, %22, %29 : vector<8x1xi1>, vector<8x1xf32>
    %c0_12 = arith.constant 0 : index
    %c0_13 = arith.constant 0 : index
    %31 = vector.load %arg4[%c0_12, %c0_13] : memref<1x1xf32, #tpu.memory_space<vmem>>, vector<1x1xf32>
    %cst_14 = arith.constant dense<0.000000e+00> : vector<1xf32>
    %32 = vector.multi_reduction <add>, %30, %cst_14 [0] : vector<8x1xf32> to vector<1xf32>
    %33 = vector.shape_cast %32 : vector<1xf32> to vector<1x1xf32>
    %34 = arith.addf %31, %33 : vector<1x1xf32>
    %c0_15 = arith.constant 0 : index
    %c0_16 = arith.constant 0 : index
    %35 = vector.load %arg4[%c0_15, %c0_16] : memref<1x1xf32, #tpu.memory_space<vmem>>, vector<1x1xf32>
    tpu.vector_store %arg4[%c0_15, %c0_16], %34 {strides = array<i32>} : memref<1x1xf32, #tpu.memory_space<vmem>>, vector<1x1xf32>,
    %c0_i32_17 = arith.constant 0 : i32
    %36 = arith.cmpi eq, %arg0, %c0_i32_17 : i32
    %37 = arith.extui %36 : i1 to i32
    %c0_i32_18 = arith.constant 0 : i32
    %38 = arith.cmpi ne, %37, %c0_i32_18 : i32
    scf.if %38 {
      %c0_19 = arith.constant 0 : index
      %c0_20 = arith.constant 0 : index
      %39 = vector.load %arg4[%c0_19, %c0_20] : memref<1x1xf32, #tpu.memory_space<vmem>>, vector<1x1xf32>
      %cst_21 = arith.constant 6.250000e-02 : f32
      %40 = vector.broadcast %cst_21 : f32 to vector<1x1xf32>
      %41 = arith.mulf %39, %40 : vector<1x1xf32>
      %c0_22 = arith.constant 0 : index
      %c0_23 = arith.constant 0 : index
      %42 = vector.load %arg4[%c0_22, %c0_23] : memref<1x1xf32, #tpu.memory_space<vmem>>, vector<1x1xf32>
      tpu.vector_store %arg4[%c0_22, %c0_23], %41 {strides = array<i32>} : memref<1x1xf32, #tpu.memory_space<vmem>>, vector<1x1xf32>,
    } else {
    }
    return
  }
  func.func @transform_0(%arg0: i32) -> (i32, i32) {
    %c0_i32 = arith.constant 0 : i32
    %c0_i32_0 = arith.constant 0 : i32
    return %arg0, %c0_i32 : i32, i32
  }
  func.func @transform_1(%arg0: i32) -> (i32, i32) {
    %c0_i32 = arith.constant 0 : i32
    %c0_i32_0 = arith.constant 0 : i32
    return %arg0, %c0_i32 : i32, i32
  }
  func.func @transform_2(%arg0: i32) -> (i32, i32) {
    %c0_i32 = arith.constant 0 : i32
    %c0_i32_0 = arith.constant 0 : i32
    return %arg0, %c0_i32 : i32, i32
  }
  func.func @transform_3(%arg0: i32) -> (i32, i32) {
    %c0_i32 = arith.constant 0 : i32
    %c0_i32_0 = arith.constant 0 : i32
    %c0_i32_1 = arith.constant 0 : i32
    return %c0_i32, %c0_i32_0 : i32, i32
  }
}

</mosaic_0001>

<bundles_post_ra>
// kernel: tpu_custom_call.1
= control target key start
LH: loop header
LB: loop body
LE: loop exit
PB: predicated region body
PF: predicated region fallthrough
CT: control target
= control target key end

     0   :  { %8 = vsyncpa [#allocation3], 0  ;;  %s206_s0 = inlined_call_operand.vmem [shape: f32[8,32], index: 0, kind: input, shape index: {}]   ;;  %s207_s1 = inlined_call_operand.hbm [shape: f32[8,32], index: 1, kind: input, shape index: {}]   ;;  %s208_s2 = inlined_call_operand.vmem [shape: f32[8,1], index: 2, kind: input, shape index: {}]   ;;  %s209_s3 = inlined_call_operand.hbm [shape: f32[1,1], index: 3, kind: output, shape index: {}]  }
   0x1   :  { %9 = vsyncpa [#allocation4], 0  ;;  %s150_s12 = smov [#allocation2]   ;;  %s102_s16 = scalar_lea.hbm %s207_s1, 128 }
   0x2   :  { %s18_s13 = sshll.u32 %s150_s12, 4  ;;  %p103_p0 = scmp.ne.s32.totalorder %s207_s1, %s102_s16  ;;  %s19_s13 = int_to_ptr.vmem [resolvable:$true] %s18_s13 }
   0x3   :  { %p106_p1 = scmp.lt.u32.totalorder %s102_s16, %s207_s1 }
   0x5   :  { %p108_p2 = pnand %p106_p1, %p103_p0 }
   0x7   :  { %111 = shalt.err (!%p108_p2)
}
   0x8   :  { %s112_s21 = scalar_lea.vmem %s19_s13, 128  ;;  %p117_p4 = scmp.lt.s32.totalorder %s19_s13, %s19_s13 }
   0x9   :  { %p113_p3 = scmp.ne.s32.totalorder %s19_s13, %s112_s21  ;;  %p118_p5 = scmp.lt.s32.totalorder %s112_s21, %s112_s21 }
   0xb   :  { %p119_p6 = por %p118_p5, %p117_p4 }
   0xd   :  { %p120_p7 = pnand %p119_p6, %p113_p3 }
   0xf   :  { %123 = shalt.err (!%p120_p7)
}
  0x10   :  { %21 = dma.hbm_to_vmem [thread:$0]  %s207_s1, 128, %s19_s13, [#allocation3]  }
  0x11   :  { %146 = dma.done.wait [#allocation3], 128  }
  0x12   :  { %147 = vsyncadd [#allocation3], 4294967168  ;;  %v33_v0 = vld [vmem:[%s206_s0] sm:$0xff]  ;;  %vm37_vm0 = vcmask 261120   ;;  %vm31_vm1 = vcmask 0   ;;  %v151_v5 = vmov 0.0  }
  0x13   :  { %v34_v1 = vld [vmem:[#allocation2] sm:$0xff]  ;;  %32 = vst.msk [vmem:[#allocation5] sm:$0x1] %vm31_vm1, %v151_v5  ;;  %vm65_vm4 = vcmask 7168   ;;  %s152_s26 = smov [#allocation5]  }
  0x14   :  { %v35_v2 = vsub.f32 %v33_v0, %v34_v1  ;;  %v51_v14 = vld [vmem:[%s208_s2] sm:$0xff]  ;;  %s88_s2 = sshll.u32 %s152_s26, 4  ;;  %s89_s2 = int_to_ptr.vmem [resolvable:$true] %s88_s2 }
  0x15   :  { %v53_v16 = vsub.f32 1.0, %v51_v14  ;;  %s124_s27 = scalar_lea.vmem %s89_s2, 16  ;;  %s128_s28 = scalar_lea.vmem %s89_s2, 32 }
  0x16   :  { %v36_v3 = vmul.f32 %v35_v2, %v35_v2  ;;  %p125_p8 = scmp.ne.s32.totalorder %s89_s2, %s124_s27  ;;  %p129_p9 = scmp.lt.s32.totalorder %s89_s2, %s89_s2 }
  0x17   :  { %p130_p10 = scmp.lt.s32.totalorder %s128_s28, %s124_s27 }
  0x18   :  { %v38_v4 = vsel %vm37_vm0, %v36_v3, 0.0 }
  0x19   :  { %39 = vadd.xlane.f32.xlu0 %v38_v4  ;;  %p131_p11 = por %p130_p10, %p129_p9 }
  0x1a   :  { %v64_v27 = vld [vmem:[#allocation5] sm:$0x1] }
  0x1b   :  { %p132_p12 = pnand %p131_p11, %p125_p8 }
  0xa6   :  { %v40_v6 = vpop.xlane.xlu0 %39 }
  0xa7   :  { %v41_v7 = vadd.f32 1e-20, %v40_v6  ;;  %v52_v18 = vmul.f32 %v51_v14, %v40_v6 }
  0xa9   :  { %100 = vrsqrt.f32 %v41_v7  ;;  %vm44_vm2 = vcmp.eq.f32.partialorder %v41_v7, inf  ;;  %v47_v10 = vand.u32 2147483648, %v41_v7  ;;  %vm46_vm3 = vcmp.eq.f32.partialorder %v41_v7, 0.0 }
  0xb3   :  { %v101_v8 = vpop.eup %100 }
  0xb4   :  { %v43_v9 = vmul.f32 %v101_v8, %v41_v7 }
  0xb6   :  { %v45_v11 = vsel %vm44_vm2, %v41_v7, %v43_v9 }
  0xb7   :  { %v48_v12 = vsel %vm46_vm3, %v47_v10, %v45_v11 }
  0xb8   :  { %v49_v13 = vsub.f32 1.0, %v48_v12 }
  0xba   :  { %v50_v15 = vmax.f32 %v49_v13, 0.0 }
  0xbc   :  { %v54_v17 = vmul.f32 %v50_v15, %v50_v15 }
  0xbe   :  { %v55_v19 = vmul.f32 %v54_v17, %v53_v16 }
  0xc0   :  { %v56_v20 = vadd.f32 %v55_v19, %v52_v18 }
  0xc2   :  { %v66_v21 = vsel %vm65_vm4, %v56_v20, 0.0 }
  0xc3   :  { %v67_v22 = vrot.slane %v66_v21, 4 }
  0xc5   :  { %v68_v23 = vadd.f32 %v67_v22, %v66_v21 }
  0xc7   :  { %v69_v24 = vrot.slane %v68_v23, 2 }
  0xc9   :  { %v70_v25 = vadd.f32 %v69_v24, %v68_v23 }
  0xcb   :  { %v71_v26 = vrot.slane %v70_v25, 1 }
  0xcd   :  { %v72_v28 = vadd.f32 %v71_v26, %v70_v25 }
  0xcf   :  { %v73_v29 = vadd.f32 %v72_v28, %v64_v27 }
  0xd1   :  { %75 = vst.msk [vmem:[#allocation5] sm:$0x1] %vm31_vm1, %v73_v29 }
  0xd8   :  { %v79_v30 = vld [vmem:[#allocation5] sm:$0x1] }
  0xd9   :  { %v80_v31 = vmul.f32 0.0625, %v79_v30 }
  0xdb   :  { %81 = vst.msk [vmem:[#allocation5] sm:$0x1] %vm31_vm1, %v80_v31 }
  0xdc   :  { %135 = shalt.err (!%p132_p12)
}
  0xdd   :  { %s136_s4 = scalar_lea.hbm %s209_s3, 16 }
  0xde   :  { %p137_p13 = scmp.ne.s32.totalorder %s209_s3, %s136_s4  ;;  %p140_p0 = scmp.lt.u32.totalorder %s136_s4, %s209_s3 }
  0xe0   :  { %p142_p1 = pnand %p140_p0, %p137_p13 }
  0xe2   :  { %145 = shalt.err (!%p142_p1)
}
  0xe3   :  { %91 = dma.vmem_to_hbm [thread:$0]  %s89_s2, 16, %s209_s3, [#allocation4]  }
  0xe4   :  { %148 = dma.done.wait [#allocation4], 16  }
  0xe5   :  { %149 = vsyncadd [#allocation4], 4294967280 }
  0xe6   :  { %95 = vsyncpa [#allocation3], 1 }
  0xe7   :  { %96 = vsyncpa [#allocation4], 1 }

</bundles_post_ra>
